<compile_context>
chip_gen: v6e
topology: v6e:2x2x1
jax: 0.10.0
libtpu: 0.0.40
codegen_flags: <defaults>
</compile_context>

<pallas_src>
import functools

import jax
import jax.numpy as jnp
from jax.experimental import pallas as pl
from jax.experimental.pallas import tpu as pltpu


def tact_mlp_gru_kernel(x_ref, w_ih_ref, w_hh_ref, b_gi_ref, b_hn_ref,
                        w_fc_ref, b_fc_ref, out_ref, *,
                        seq_len, batch, batch_pad, hidden, gate_pad):
    T, B, Bp, H, G = seq_len, batch, batch_pad, hidden, gate_pad
    mm_dtype = w_hh_ref.dtype     # bf16 (default) or f32 recurrent-matmul operands

    # ---- Hoisted input projection: one matmul over all (sublane-padded) timesteps,
    #      off the serial recurrence path. Biases pre-folded (b_ih + b_hh for r/z).
    gi_all = (jnp.dot(x_ref[...], w_ih_ref[...],
                      preferred_element_type=jnp.float32)
              + b_gi_ref[...])                                      # (T*Bp, G)

    b_hn = jnp.broadcast_to(b_hn_ref[...], (Bp, H))                 # hoisted broadcast
    zeros_pad = jnp.zeros((Bp, G - H), jnp.float32)                 # hoisted

    # ---- Sequential GRU recurrence, statically unrolled (T small & static).
    h_act = jnp.zeros((Bp, H), jnp.float32)                         # live hidden state
    for t in range(T):
        # Sublane-aligned whole-tile row select (Bp is a multiple of 8).
        gi = gi_all[t * Bp:(t + 1) * Bp, :]
        if t == 0:
            # h0 == 0 -> recurrent matmul skipped (saves 1 of T serialized MXU ops).
            pre = gi
            hn_term = b_hn
        else:
            h_full = jnp.concatenate([h_act, zeros_pad], axis=1)    # (Bp, G)
            # Single 128-lane-wide MXU tile per step; f32 accumulation.
            gh = jnp.dot(h_full.astype(mm_dtype), w_hh_ref[...],
                         preferred_element_type=jnp.float32)        # (Bp, G)
            pre = gi + gh
            hn_term = gh[:, 2 * H:3 * H] + b_hn
        # Fused r|z sigmoid: one EUP pass over the packed lanes; the gate slices
        # below are sub-vreg lane selects handled off the MXU/VPU chain.
        sig = jax.nn.sigmoid(pre)
        r = sig[:, 0:H]
        z = sig[:, H:2 * H]
        n = jnp.tanh(gi[:, 2 * H:3 * H] + r * hn_term)
        new_h = (1.0 - z) * n
        if t > 0:
            new_h = new_h + z * h_act
        h_act = new_h

    # ---- Output projection on the final hidden state (O=10 -> masked store, fine).
    h_full = jnp.concatenate([h_act, zeros_pad], axis=1)
    y = (jnp.dot(h_full, w_fc_ref[...], preferred_element_type=jnp.float32)
         + b_fc_ref[...])                                           # (Bp, O)
    out_ref[...] = y[0:B, :]


def prepare_params(params, recurrent_dtype=jnp.bfloat16):
    """PyTorch-layout GRU/FC params -> packed-gate, lane-padded, transposed.

    Call ONCE at init and cache the result; every forward call reuses it.
    Gate packing: r|z|n occupy lanes [0:H), [H:2H), [2H:3H) of a single
    128-lane-aligned tile (G = round_up(3H, 128)), so the recurrent weight is a
    single MXU column tile.
    """
    three_h, in_size = params["w_ih"].shape
    H = three_h // 3
    O = params["w_fc"].shape[0]
    G = ((3 * H + 127) // 128) * 128             # H=32 -> G=128 (one lane tile)

    w_ih_p = jnp.zeros((in_size, G), jnp.float32)
    w_hh_p = jnp.zeros((G, G), jnp.float32)
    for g in range(3):                            # PyTorch gate order: r, z, n
        w_ih_p = w_ih_p.at[:, g * H:(g + 1) * H].set(
            params["w_ih"][g * H:(g + 1) * H, :].T)
        w_hh_p = w_hh_p.at[:H, g * H:(g + 1) * H].set(
            params["w_hh"][g * H:(g + 1) * H, :].T)

    b_ih, b_hh = params["b_ih"], params["b_hh"]
    b_gi = jnp.zeros((1, G), jnp.float32)
    b_gi = b_gi.at[0, 0:H].set(b_ih[0:H] + b_hh[0:H])                # r (b_hh folded)
    b_gi = b_gi.at[0, H:2 * H].set(b_ih[H:2 * H] + b_hh[H:2 * H])    # z (b_hh folded)
    b_gi = b_gi.at[0, 2 * H:3 * H].set(b_ih[2 * H:3 * H])            # n (input-side)
    b_hn = b_hh[2 * H:3 * H].reshape(1, H).astype(jnp.float32)

    w_fc_p = jnp.zeros((G, O), jnp.float32).at[:H, :].set(params["w_fc"].T)
    b_fc = params["b_fc"].reshape(1, O).astype(jnp.float32)

    return {
        "w_ih": w_ih_p,
        "w_hh": w_hh_p.astype(recurrent_dtype),   # bf16 operands on the serial path
        "b_gi": b_gi,
        "b_hn": b_hn,
        "w_fc": w_fc_p,
        "b_fc": b_fc,
    }


@jax.jit
def tact_mlp_gru_forward(in_tact, prepared):
    # torch: in_tact.squeeze().permute(2, 0, 1) -- explicit axis so B==1/T==1 is safe.
    x = jnp.squeeze(in_tact, axis=2)                          # (B, 156, T)
    x = jnp.transpose(x, (2, 0, 1)).astype(jnp.float32)       # (T, B, 156)
    T, B, in_size = x.shape

    # Pad batch to a sublane multiple so each timestep's row block is tile-aligned.
    Bp = ((B + 7) // 8) * 8
    x = jnp.pad(x, ((0, 0), (0, Bp - B), (0, 0)))
    x_flat = x.reshape(T * Bp, in_size)                       # rows [t*Bp:(t+1)*Bp] = step t

    w_hh = prepared["w_hh"]
    G = w_hh.shape[0]
    H = prepared["b_hn"].shape[1]
    O = prepared["b_fc"].shape[1]

    kernel = functools.partial(tact_mlp_gru_kernel, seq_len=T, batch=B,
                               batch_pad=Bp, hidden=H, gate_pad=G)
    vmem = pl.BlockSpec(memory_space=pltpu.MemorySpace.VMEM)  # whole array, VMEM-resident

    # Single invocation: no grid, no per-step DMA machinery; total footprint << 1 MiB.
    return pl.pallas_call(
        kernel,
        out_shape=jax.ShapeDtypeStruct((B, O), jnp.float32),
        in_specs=[vmem] * 7,
        out_specs=vmem,
    )(x_flat, prepared["w_ih"], w_hh, prepared["b_gi"], prepared["b_hn"],
      prepared["w_fc"], prepared["b_fc"])


def init_params(key, input_size, hidden_size, output_size):
    # PyTorch-layout parameters, uniform +-1/sqrt(H) like torch's default init.
    ks = jax.random.split(key, 6)
    bound = 1.0 / jnp.sqrt(jnp.float32(hidden_size))
    u = lambda k, shape: jax.random.uniform(k, shape, jnp.float32, -bound, bound)
    return {
        "w_ih": u(ks[0], (3 * hidden_size, input_size)),   # gru.weight_ih_l0 (r,z,n)
        "w_hh": u(ks[1], (3 * hidden_size, hidden_size)),  # gru.weight_hh_l0
        "b_ih": u(ks[2], (3 * hidden_size,)),              # gru.bias_ih_l0
        "b_hh": u(ks[3], (3 * hidden_size,)),              # gru.bias_hh_l0
        "w_fc": u(ks[4], (output_size, hidden_size)),      # fc.weight
        "b_fc": u(ks[5], (output_size,)),                  # fc.bias
    }


def reference_forward(in_tact, params):
    # Pure-JAX reference of the PyTorch module's math (unpadded, per-step, f32).
    x = jnp.transpose(jnp.squeeze(in_tact, axis=2), (2, 0, 1)).astype(jnp.float32)
    T, B, _ = x.shape
    H = params["w_hh"].shape[1]

    def step(h, xt):
        gi = xt @ params["w_ih"].T + params["b_ih"]
        gh = h @ params["w_hh"].T + params["b_hh"]
        r = jax.nn.sigmoid(gi[:, :H] + gh[:, :H])
        z = jax.nn.sigmoid(gi[:, H:2 * H] + gh[:, H:2 * H])
        n = jnp.tanh(gi[:, 2 * H:] + r * gh[:, 2 * H:])
        return (1.0 - z) * n + z * h, None

    hT, _ = jax.lax.scan(step, jnp.zeros((B, H), jnp.float32), x)
    return hT @ params["w_fc"].T + params["b_fc"]


if __name__ == "__main__":
    INPUT_SIZE = 156     # fixed by the module
    HIDDEN_SIZE = 32
    OUTPUT_SIZE = 10
    B, T = 2, 8

    key = jax.random.PRNGKey(0)
    k_x, k_p = jax.random.split(key)

    # PyTorch-style input: (B, 156, 1, T); squeeze+permute happens in the wrapper.
    in_tact = jax.random.normal(k_x, (B, INPUT_SIZE, 1, T), dtype=jnp.float32)
    params = init_params(k_p, INPUT_SIZE, HIDDEN_SIZE, OUTPUT_SIZE)

    y_ref = reference_forward(in_tact, params)

    # Default path: bf16 recurrent-matmul operands (f32 accumulation + gate math).
    # Checked against the f32 nn.GRU reference with a correspondingly looser tolerance.
    prepared_bf16 = prepare_params(params, recurrent_dtype=jnp.bfloat16)
    y = jax.block_until_ready(tact_mlp_gru_forward(in_tact, prepared_bf16))
    assert y.shape == (B, OUTPUT_SIZE)
    assert jnp.allclose(y, y_ref, atol=5e-2, rtol=5e-2), "bf16 kernel mismatch vs reference"

    # f32 recurrent matmul: tight check that the packed-gate math is exact.
    prepared_f32 = prepare_params(params, recurrent_dtype=jnp.float32)
    y32 = jax.block_until_ready(tact_mlp_gru_forward(in_tact, prepared_f32))
    assert jnp.allclose(y32, y_ref, atol=1e-4, rtol=1e-4), "f32 kernel mismatch vs reference"

    print("KERNEL_OK")
</pallas_src>

<mosaic_0001>
module attributes {stable_mosaic.version = 11 : i64} {
  func.func @tact_mlp_gru_kernel(%arg0: memref<64x156xf32, #tpu.memory_space<vmem>>, %arg1: memref<156x128xf32, #tpu.memory_space<vmem>>, %arg2: memref<128x128xbf16, #tpu.memory_space<vmem>>, %arg3: memref<1x128xf32, #tpu.memory_space<vmem>>, %arg4: memref<1x32xf32, #tpu.memory_space<vmem>>, %arg5: memref<128x10xf32, #tpu.memory_space<vmem>>, %arg6: memref<1x10xf32, #tpu.memory_space<vmem>>, %arg7: memref<2x10xf32, #tpu.memory_space<vmem>>) attributes {dimension_semantics = [], scalar_prefetch = 0 : i64, scratch_operands = 0 : i64, tpu.core_type = #tpu.core_type<tc>} {
    %c0 = arith.constant 0 : index
    %c0_0 = arith.constant 0 : index
    %0 = vector.load %arg0[%c0, %c0_0] : memref<64x156xf32, #tpu.memory_space<vmem>>, vector<64x156xf32>
    %c0_1 = arith.constant 0 : index
    %c0_2 = arith.constant 0 : index
    %1 = vector.load %arg1[%c0_1, %c0_2] : memref<156x128xf32, #tpu.memory_space<vmem>>, vector<156x128xf32>
    %cst = arith.constant dense<0.000000e+00> : vector<64x128xf32>
    %2 = tpu.matmul %0, %1, %cst {dimension_numbers = #tpu.dot_dimension_numbers<[1], [0], [0], [1], [0, 0, 1, 1], [], []>} : vector<64x156xf32>, vector<156x128xf32>, vector<64x128xf32> -> vector<64x128xf32>
    %c0_3 = arith.constant 0 : index
    %c0_4 = arith.constant 0 : index
    %3 = vector.load %arg3[%c0_3, %c0_4] : memref<1x128xf32, #tpu.memory_space<vmem>>, vector<1x128xf32>
    %4 = vector.broadcast %3 : vector<1x128xf32> to vector<64x128xf32>
    %5 = arith.addf %2, %4 : vector<64x128xf32>
    %c0_5 = arith.constant 0 : index
    %c0_6 = arith.constant 0 : index
    %6 = vector.load %arg4[%c0_5, %c0_6] : memref<1x32xf32, #tpu.memory_space<vmem>>, vector<1x32xf32>
    %7 = vector.shape_cast %6 : vector<1x32xf32> to vector<1x32xf32>
    %8 = vector.broadcast %7 : vector<1x32xf32> to vector<8x32xf32>
    %cst_7 = arith.constant 0.000000e+00 : f32
    %9 = vector.broadcast %cst_7 : f32 to vector<8x96xf32>
    %10 = vector.extract_strided_slice %5 {offsets = [0, 0], sizes = [8, 128], strides = [1, 1]} : vector<64x128xf32> to vector<8x128xf32>
    %11 = arith.negf %10 : vector<8x128xf32>
    %12 = math.exp %11 : vector<8x128xf32>
    %cst_8 = arith.constant 1.000000e+00 : f32
    %13 = vector.broadcast %cst_8 : f32 to vector<8x128xf32>
    %14 = arith.addf %13, %12 : vector<8x128xf32>
    %15 = arith.divf %13, %14 : vector<8x128xf32>
    %16 = vector.extract_strided_slice %15 {offsets = [0, 0], sizes = [8, 32], strides = [1, 1]} : vector<8x128xf32> to vector<8x32xf32>
    %17 = vector.extract_strided_slice %15 {offsets = [0, 32], sizes = [8, 32], strides = [1, 1]} : vector<8x128xf32> to vector<8x32xf32>
    %18 = vector.extract_strided_slice %10 {offsets = [0, 64], sizes = [8, 32], strides = [1, 1]} : vector<8x128xf32> to vector<8x32xf32>
    %19 = arith.mulf %16, %8 : vector<8x32xf32>
    %20 = arith.addf %18, %19 : vector<8x32xf32>
    %21 = math.tanh %20 : vector<8x32xf32>
    %cst_9 = arith.constant 1.000000e+00 : f32
    %22 = vector.broadcast %cst_9 : f32 to vector<8x32xf32>
    %23 = arith.subf %22, %17 : vector<8x32xf32>
    %24 = arith.mulf %23, %21 : vector<8x32xf32>
    %25 = vector.extract_strided_slice %5 {offsets = [8, 0], sizes = [8, 128], strides = [1, 1]} : vector<64x128xf32> to vector<8x128xf32>
    %26 = tpu.concatenate %24, %9 in 1 : vector<8x32xf32>, vector<8x96xf32> -> vector<8x128xf32>
    %27 = arith.truncf %26 : vector<8x128xf32> to vector<8x128xbf16>
    %c0_10 = arith.constant 0 : index
    %c0_11 = arith.constant 0 : index
    %28 = vector.load %arg2[%c0_10, %c0_11] : memref<128x128xbf16, #tpu.memory_space<vmem>>, vector<128x128xbf16>
    %cst_12 = arith.constant dense<0.000000e+00> : vector<8x128xf32>
    %29 = tpu.matmul %27, %28, %cst_12 {dimension_numbers = #tpu.dot_dimension_numbers<[1], [0], [0], [1], [0, 0, 1, 1], [], []>} : vector<8x128xbf16>, vector<128x128xbf16>, vector<8x128xf32> -> vector<8x128xf32>
    %30 = arith.addf %25, %29 : vector<8x128xf32>
    %31 = vector.extract_strided_slice %29 {offsets = [0, 64], sizes = [8, 32], strides = [1, 1]} : vector<8x128xf32> to vector<8x32xf32>
    %32 = arith.addf %31, %8 : vector<8x32xf32>
    %33 = arith.negf %30 : vector<8x128xf32>
    %34 = math.exp %33 : vector<8x128xf32>
    %cst_13 = arith.constant 1.000000e+00 : f32
    %35 = vector.broadcast %cst_13 : f32 to vector<8x128xf32>
    %36 = arith.addf %35, %34 : vector<8x128xf32>
    %37 = arith.divf %35, %36 : vector<8x128xf32>
    %38 = vector.extract_strided_slice %37 {offsets = [0, 0], sizes = [8, 32], strides = [1, 1]} : vector<8x128xf32> to vector<8x32xf32>
    %39 = vector.extract_strided_slice %37 {offsets = [0, 32], sizes = [8, 32], strides = [1, 1]} : vector<8x128xf32> to vector<8x32xf32>
    %40 = vector.extract_strided_slice %25 {offsets = [0, 64], sizes = [8, 32], strides = [1, 1]} : vector<8x128xf32> to vector<8x32xf32>
    %41 = arith.mulf %38, %32 : vector<8x32xf32>
    %42 = arith.addf %40, %41 : vector<8x32xf32>
    %43 = math.tanh %42 : vector<8x32xf32>
    %cst_14 = arith.constant 1.000000e+00 : f32
    %44 = vector.broadcast %cst_14 : f32 to vector<8x32xf32>
    %45 = arith.subf %44, %39 : vector<8x32xf32>
    %46 = arith.mulf %45, %43 : vector<8x32xf32>
    %47 = arith.mulf %39, %24 : vector<8x32xf32>
    %48 = arith.addf %46, %47 : vector<8x32xf32>
    %49 = vector.extract_strided_slice %5 {offsets = [16, 0], sizes = [8, 128], strides = [1, 1]} : vector<64x128xf32> to vector<8x128xf32>
    %50 = tpu.concatenate %48, %9 in 1 : vector<8x32xf32>, vector<8x96xf32> -> vector<8x128xf32>
    %51 = arith.truncf %50 : vector<8x128xf32> to vector<8x128xbf16>
    %c0_15 = arith.constant 0 : index
    %c0_16 = arith.constant 0 : index
    %52 = vector.load %arg2[%c0_15, %c0_16] : memref<128x128xbf16, #tpu.memory_space<vmem>>, vector<128x128xbf16>
    %cst_17 = arith.constant dense<0.000000e+00> : vector<8x128xf32>
    %53 = tpu.matmul %51, %52, %cst_17 {dimension_numbers = #tpu.dot_dimension_numbers<[1], [0], [0], [1], [0, 0, 1, 1], [], []>} : vector<8x128xbf16>, vector<128x128xbf16>, vector<8x128xf32> -> vector<8x128xf32>
    %54 = arith.addf %49, %53 : vector<8x128xf32>
    %55 = vector.extract_strided_slice %53 {offsets = [0, 64], sizes = [8, 32], strides = [1, 1]} : vector<8x128xf32> to vector<8x32xf32>
    %56 = arith.addf %55, %8 : vector<8x32xf32>
    %57 = arith.negf %54 : vector<8x128xf32>
    %58 = math.exp %57 : vector<8x128xf32>
    %cst_18 = arith.constant 1.000000e+00 : f32
    %59 = vector.broadcast %cst_18 : f32 to vector<8x128xf32>
    %60 = arith.addf %59, %58 : vector<8x128xf32>
    %61 = arith.divf %59, %60 : vector<8x128xf32>
    %62 = vector.extract_strided_slice %61 {offsets = [0, 0], sizes = [8, 32], strides = [1, 1]} : vector<8x128xf32> to vector<8x32xf32>
    %63 = vector.extract_strided_slice %61 {offsets = [0, 32], sizes = [8, 32], strides = [1, 1]} : vector<8x128xf32> to vector<8x32xf32>
    %64 = vector.extract_strided_slice %49 {offsets = [0, 64], sizes = [8, 32], strides = [1, 1]} : vector<8x128xf32> to vector<8x32xf32>
    %65 = arith.mulf %62, %56 : vector<8x32xf32>
    %66 = arith.addf %64, %65 : vector<8x32xf32>
    %67 = math.tanh %66 : vector<8x32xf32>
    %cst_19 = arith.constant 1.000000e+00 : f32
    %68 = vector.broadcast %cst_19 : f32 to vector<8x32xf32>
    %69 = arith.subf %68, %63 : vector<8x32xf32>
    %70 = arith.mulf %69, %67 : vector<8x32xf32>
    %71 = arith.mulf %63, %48 : vector<8x32xf32>
    %72 = arith.addf %70, %71 : vector<8x32xf32>
    %73 = vector.extract_strided_slice %5 {offsets = [24, 0], sizes = [8, 128], strides = [1, 1]} : vector<64x128xf32> to vector<8x128xf32>
    %74 = tpu.concatenate %72, %9 in 1 : vector<8x32xf32>, vector<8x96xf32> -> vector<8x128xf32>
    %75 = arith.truncf %74 : vector<8x128xf32> to vector<8x128xbf16>
    %c0_20 = arith.constant 0 : index
    %c0_21 = arith.constant 0 : index
    %76 = vector.load %arg2[%c0_20, %c0_21] : memref<128x128xbf16, #tpu.memory_space<vmem>>, vector<128x128xbf16>
    %cst_22 = arith.constant dense<0.000000e+00> : vector<8x128xf32>
    %77 = tpu.matmul %75, %76, %cst_22 {dimension_numbers = #tpu.dot_dimension_numbers<[1], [0], [0], [1], [0, 0, 1, 1], [], []>} : vector<8x128xbf16>, vector<128x128xbf16>, vector<8x128xf32> -> vector<8x128xf32>
    %78 = arith.addf %73, %77 : vector<8x128xf32>
    %79 = vector.extract_strided_slice %77 {offsets = [0, 64], sizes = [8, 32], strides = [1, 1]} : vector<8x128xf32> to vector<8x32xf32>
    %80 = arith.addf %79, %8 : vector<8x32xf32>
    %81 = arith.negf %78 : vector<8x128xf32>
    %82 = math.exp %81 : vector<8x128xf32>
    %cst_23 = arith.constant 1.000000e+00 : f32
    %83 = vector.broadcast %cst_23 : f32 to vector<8x128xf32>
    %84 = arith.addf %83, %82 : vector<8x128xf32>
    %85 = arith.divf %83, %84 : vector<8x128xf32>
    %86 = vector.extract_strided_slice %85 {offsets = [0, 0], sizes = [8, 32], strides = [1, 1]} : vector<8x128xf32> to vector<8x32xf32>
    %87 = vector.extract_strided_slice %85 {offsets = [0, 32], sizes = [8, 32], strides = [1, 1]} : vector<8x128xf32> to vector<8x32xf32>
    %88 = vector.extract_strided_slice %73 {offsets = [0, 64], sizes = [8, 32], strides = [1, 1]} : vector<8x128xf32> to vector<8x32xf32>
    %89 = arith.mulf %86, %80 : vector<8x32xf32>
    %90 = arith.addf %88, %89 : vector<8x32xf32>
    %91 = math.tanh %90 : vector<8x32xf32>
    %cst_24 = arith.constant 1.000000e+00 : f32
    %92 = vector.broadcast %cst_24 : f32 to vector<8x32xf32>
    %93 = arith.subf %92, %87 : vector<8x32xf32>
    %94 = arith.mulf %93, %91 : vector<8x32xf32>
    %95 = arith.mulf %87, %72 : vector<8x32xf32>
    %96 = arith.addf %94, %95 : vector<8x32xf32>
    %97 = vector.extract_strided_slice %5 {offsets = [32, 0], sizes = [8, 128], strides = [1, 1]} : vector<64x128xf32> to vector<8x128xf32>
    %98 = tpu.concatenate %96, %9 in 1 : vector<8x32xf32>, vector<8x96xf32> -> vector<8x128xf32>
    %99 = arith.truncf %98 : vector<8x128xf32> to vector<8x128xbf16>
    %c0_25 = arith.constant 0 : index
    %c0_26 = arith.constant 0 : index
    %100 = vector.load %arg2[%c0_25, %c0_26] : memref<128x128xbf16, #tpu.memory_space<vmem>>, vector<128x128xbf16>
    %cst_27 = arith.constant dense<0.000000e+00> : vector<8x128xf32>
    %101 = tpu.matmul %99, %100, %cst_27 {dimension_numbers = #tpu.dot_dimension_numbers<[1], [0], [0], [1], [0, 0, 1, 1], [], []>} : vector<8x128xbf16>, vector<128x128xbf16>, vector<8x128xf32> -> vector<8x128xf32>
    %102 = arith.addf %97, %101 : vector<8x128xf32>
    %103 = vector.extract_strided_slice %101 {offsets = [0, 64], sizes = [8, 32], strides = [1, 1]} : vector<8x128xf32> to vector<8x32xf32>
    %104 = arith.addf %103, %8 : vector<8x32xf32>
    %105 = arith.negf %102 : vector<8x128xf32>
    %106 = math.exp %105 : vector<8x128xf32>
    %cst_28 = arith.constant 1.000000e+00 : f32
    %107 = vector.broadcast %cst_28 : f32 to vector<8x128xf32>
    %108 = arith.addf %107, %106 : vector<8x128xf32>
    %109 = arith.divf %107, %108 : vector<8x128xf32>
    %110 = vector.extract_strided_slice %109 {offsets = [0, 0], sizes = [8, 32], strides = [1, 1]} : vector<8x128xf32> to vector<8x32xf32>
    %111 = vector.extract_strided_slice %109 {offsets = [0, 32], sizes = [8, 32], strides = [1, 1]} : vector<8x128xf32> to vector<8x32xf32>
    %112 = vector.extract_strided_slice %97 {offsets = [0, 64], sizes = [8, 32], strides = [1, 1]} : vector<8x128xf32> to vector<8x32xf32>
    %113 = arith.mulf %110, %104 : vector<8x32xf32>
    %114 = arith.addf %112, %113 : vector<8x32xf32>
    %115 = math.tanh %114 : vector<8x32xf32>
    %cst_29 = arith.constant 1.000000e+00 : f32
    %116 = vector.broadcast %cst_29 : f32 to vector<8x32xf32>
    %117 = arith.subf %116, %111 : vector<8x32xf32>
    %118 = arith.mulf %117, %115 : vector<8x32xf32>
    %119 = arith.mulf %111, %96 : vector<8x32xf32>
    %120 = arith.addf %118, %119 : vector<8x32xf32>
    %121 = vector.extract_strided_slice %5 {offsets = [40, 0], sizes = [8, 128], strides = [1, 1]} : vector<64x128xf32> to vector<8x128xf32>
    %122 = tpu.concatenate %120, %9 in 1 : vector<8x32xf32>, vector<8x96xf32> -> vector<8x128xf32>
    %123 = arith.truncf %122 : vector<8x128xf32> to vector<8x128xbf16>
    %c0_30 = arith.constant 0 : index
    %c0_31 = arith.constant 0 : index
    %124 = vector.load %arg2[%c0_30, %c0_31] : memref<128x128xbf16, #tpu.memory_space<vmem>>, vector<128x128xbf16>
    %cst_32 = arith.constant dense<0.000000e+00> : vector<8x128xf32>
    %125 = tpu.matmul %123, %124, %cst_32 {dimension_numbers = #tpu.dot_dimension_numbers<[1], [0], [0], [1], [0, 0, 1, 1], [], []>} : vector<8x128xbf16>, vector<128x128xbf16>, vector<8x128xf32> -> vector<8x128xf32>
    %126 = arith.addf %121, %125 : vector<8x128xf32>
    %127 = vector.extract_strided_slice %125 {offsets = [0, 64], sizes = [8, 32], strides = [1, 1]} : vector<8x128xf32> to vector<8x32xf32>
    %128 = arith.addf %127, %8 : vector<8x32xf32>
    %129 = arith.negf %126 : vector<8x128xf32>
    %130 = math.exp %129 : vector<8x128xf32>
    %cst_33 = arith.constant 1.000000e+00 : f32
    %131 = vector.broadcast %cst_33 : f32 to vector<8x128xf32>
    %132 = arith.addf %131, %130 : vector<8x128xf32>
    %133 = arith.divf %131, %132 : vector<8x128xf32>
    %134 = vector.extract_strided_slice %133 {offsets = [0, 0], sizes = [8, 32], strides = [1, 1]} : vector<8x128xf32> to vector<8x32xf32>
    %135 = vector.extract_strided_slice %133 {offsets = [0, 32], sizes = [8, 32], strides = [1, 1]} : vector<8x128xf32> to vector<8x32xf32>
    %136 = vector.extract_strided_slice %121 {offsets = [0, 64], sizes = [8, 32], strides = [1, 1]} : vector<8x128xf32> to vector<8x32xf32>
    %137 = arith.mulf %134, %128 : vector<8x32xf32>
    %138 = arith.addf %136, %137 : vector<8x32xf32>
    %139 = math.tanh %138 : vector<8x32xf32>
    %cst_34 = arith.constant 1.000000e+00 : f32
    %140 = vector.broadcast %cst_34 : f32 to vector<8x32xf32>
    %141 = arith.subf %140, %135 : vector<8x32xf32>
    %142 = arith.mulf %141, %139 : vector<8x32xf32>
    %143 = arith.mulf %135, %120 : vector<8x32xf32>
    %144 = arith.addf %142, %143 : vector<8x32xf32>
    %145 = vector.extract_strided_slice %5 {offsets = [48, 0], sizes = [8, 128], strides = [1, 1]} : vector<64x128xf32> to vector<8x128xf32>
    %146 = tpu.concatenate %144, %9 in 1 : vector<8x32xf32>, vector<8x96xf32> -> vector<8x128xf32>
    %147 = arith.truncf %146 : vector<8x128xf32> to vector<8x128xbf16>
    %c0_35 = arith.constant 0 : index
    %c0_36 = arith.constant 0 : index
    %148 = vector.load %arg2[%c0_35, %c0_36] : memref<128x128xbf16, #tpu.memory_space<vmem>>, vector<128x128xbf16>
    %cst_37 = arith.constant dense<0.000000e+00> : vector<8x128xf32>
    %149 = tpu.matmul %147, %148, %cst_37 {dimension_numbers = #tpu.dot_dimension_numbers<[1], [0], [0], [1], [0, 0, 1, 1], [], []>} : vector<8x128xbf16>, vector<128x128xbf16>, vector<8x128xf32> -> vector<8x128xf32>
    %150 = arith.addf %145, %149 : vector<8x128xf32>
    %151 = vector.extract_strided_slice %149 {offsets = [0, 64], sizes = [8, 32], strides = [1, 1]} : vector<8x128xf32> to vector<8x32xf32>
    %152 = arith.addf %151, %8 : vector<8x32xf32>
    %153 = arith.negf %150 : vector<8x128xf32>
    %154 = math.exp %153 : vector<8x128xf32>
    %cst_38 = arith.constant 1.000000e+00 : f32
    %155 = vector.broadcast %cst_38 : f32 to vector<8x128xf32>
    %156 = arith.addf %155, %154 : vector<8x128xf32>
    %157 = arith.divf %155, %156 : vector<8x128xf32>
    %158 = vector.extract_strided_slice %157 {offsets = [0, 0], sizes = [8, 32], strides = [1, 1]} : vector<8x128xf32> to vector<8x32xf32>
    %159 = vector.extract_strided_slice %157 {offsets = [0, 32], sizes = [8, 32], strides = [1, 1]} : vector<8x128xf32> to vector<8x32xf32>
    %160 = vector.extract_strided_slice %145 {offsets = [0, 64], sizes = [8, 32], strides = [1, 1]} : vector<8x128xf32> to vector<8x32xf32>
    %161 = arith.mulf %158, %152 : vector<8x32xf32>
    %162 = arith.addf %160, %161 : vector<8x32xf32>
    %163 = math.tanh %162 : vector<8x32xf32>
    %cst_39 = arith.constant 1.000000e+00 : f32
    %164 = vector.broadcast %cst_39 : f32 to vector<8x32xf32>
    %165 = arith.subf %164, %159 : vector<8x32xf32>
    %166 = arith.mulf %165, %163 : vector<8x32xf32>
    %167 = arith.mulf %159, %144 : vector<8x32xf32>
    %168 = arith.addf %166, %167 : vector<8x32xf32>
    %169 = vector.extract_strided_slice %5 {offsets = [56, 0], sizes = [8, 128], strides = [1, 1]} : vector<64x128xf32> to vector<8x128xf32>
    %170 = tpu.concatenate %168, %9 in 1 : vector<8x32xf32>, vector<8x96xf32> -> vector<8x128xf32>
    %171 = arith.truncf %170 : vector<8x128xf32> to vector<8x128xbf16>
    %c0_40 = arith.constant 0 : index
    %c0_41 = arith.constant 0 : index
    %172 = vector.load %arg2[%c0_40, %c0_41] : memref<128x128xbf16, #tpu.memory_space<vmem>>, vector<128x128xbf16>
    %cst_42 = arith.constant dense<0.000000e+00> : vector<8x128xf32>
    %173 = tpu.matmul %171, %172, %cst_42 {dimension_numbers = #tpu.dot_dimension_numbers<[1], [0], [0], [1], [0, 0, 1, 1], [], []>} : vector<8x128xbf16>, vector<128x128xbf16>, vector<8x128xf32> -> vector<8x128xf32>
    %174 = arith.addf %169, %173 : vector<8x128xf32>
    %175 = vector.extract_strided_slice %173 {offsets = [0, 64], sizes = [8, 32], strides = [1, 1]} : vector<8x128xf32> to vector<8x32xf32>
    %176 = arith.addf %175, %8 : vector<8x32xf32>
    %177 = arith.negf %174 : vector<8x128xf32>
    %178 = math.exp %177 : vector<8x128xf32>
    %cst_43 = arith.constant 1.000000e+00 : f32
    %179 = vector.broadcast %cst_43 : f32 to vector<8x128xf32>
    %180 = arith.addf %179, %178 : vector<8x128xf32>
    %181 = arith.divf %179, %180 : vector<8x128xf32>
    %182 = vector.extract_strided_slice %181 {offsets = [0, 0], sizes = [8, 32], strides = [1, 1]} : vector<8x128xf32> to vector<8x32xf32>
    %183 = vector.extract_strided_slice %181 {offsets = [0, 32], sizes = [8, 32], strides = [1, 1]} : vector<8x128xf32> to vector<8x32xf32>
    %184 = vector.extract_strided_slice %169 {offsets = [0, 64], sizes = [8, 32], strides = [1, 1]} : vector<8x128xf32> to vector<8x32xf32>
    %185 = arith.mulf %182, %176 : vector<8x32xf32>
    %186 = arith.addf %184, %185 : vector<8x32xf32>
    %187 = math.tanh %186 : vector<8x32xf32>
    %cst_44 = arith.constant 1.000000e+00 : f32
    %188 = vector.broadcast %cst_44 : f32 to vector<8x32xf32>
    %189 = arith.subf %188, %183 : vector<8x32xf32>
    %190 = arith.mulf %189, %187 : vector<8x32xf32>
    %191 = arith.mulf %183, %168 : vector<8x32xf32>
    %192 = arith.addf %190, %191 : vector<8x32xf32>
    %193 = tpu.concatenate %192, %9 in 1 : vector<8x32xf32>, vector<8x96xf32> -> vector<8x128xf32>
    %c0_45 = arith.constant 0 : index
    %c0_46 = arith.constant 0 : index
    %194 = vector.load %arg5[%c0_45, %c0_46] : memref<128x10xf32, #tpu.memory_space<vmem>>, vector<128x10xf32>
    %cst_47 = arith.constant dense<0.000000e+00> : vector<8x10xf32>
    %195 = tpu.matmul %193, %194, %cst_47 {dimension_numbers = #tpu.dot_dimension_numbers<[1], [0], [0], [1], [0, 0, 1, 1], [], []>} : vector<8x128xf32>, vector<128x10xf32>, vector<8x10xf32> -> vector<8x10xf32>
    %c0_48 = arith.constant 0 : index
    %c0_49 = arith.constant 0 : index
    %196 = vector.load %arg6[%c0_48, %c0_49] : memref<1x10xf32, #tpu.memory_space<vmem>>, vector<1x10xf32>
    %197 = vector.broadcast %196 : vector<1x10xf32> to vector<8x10xf32>
    %198 = arith.addf %195, %197 : vector<8x10xf32>
    %199 = vector.extract_strided_slice %198 {offsets = [0, 0], sizes = [2, 10], strides = [1, 1]} : vector<8x10xf32> to vector<2x10xf32>
    %c0_50 = arith.constant 0 : index
    %c0_51 = arith.constant 0 : index
    %200 = vector.load %arg7[%c0_50, %c0_51] : memref<2x10xf32, #tpu.memory_space<vmem>>, vector<2x10xf32>
    tpu.vector_store %arg7[%c0_50, %c0_51], %199 {strides = array<i32>} : memref<2x10xf32, #tpu.memory_space<vmem>>, vector<2x10xf32>,
    return
  }
}

</mosaic_0001>

<bundles_post_ra>
// kernel: tact_mlp_gru_forward.1
= control target key start
LH: loop header
LB: loop body
LE: loop exit
PB: predicated region body
PF: predicated region fallthrough
CT: control target
= control target key end

     0   :  { %v1312_v1 = vmov 0.0   ;;  %vm71_vm0 = vcmask 228352   ;;  %s1829_s0 = inlined_call_operand.vmem [shape: f32[64,156], index: 0, kind: input, shape index: {}]   ;;  %s1830_s1 = inlined_call_operand.vmem [shape: f32[156,128], index: 1, kind: input, shape index: {}]   ;;  %s1831_s2 = inlined_call_operand.vmem [shape: bf16[128,128], index: 2, kind: input, shape index: {}]   ;;  %s1832_s3 = inlined_call_operand.vmem [shape: f32[1,128], index: 3, kind: input, shape index: {}]   ;;  %s1833_s4 = inlined_call_operand.vmem [shape: f32[1,32], index: 4, kind: input, shape index: {}]   ;;  %s1834_s5 = inlined_call_operand.vmem [shape: f32[128,10], index: 5, kind: input, shape index: {}]   ;;  %s1835_s6 = inlined_call_operand.vmem [shape: f32[1,10], index: 6, kind: input, shape index: {}]   ;;  %s1836_s7 = inlined_call_operand.hbm [shape: f32[2,10], index: 7, kind: output, shape index: {}]  }
   0x1   :  { %v59_v0 = vld [vmem:[%s1830_s1 + $0x78] sm:$0xff]  ;;  %100 = vmatprep.subr.mxu0 %v1312_v1  ;;  %v58_v2 = vld [vmem:[%s1830_s1 + $0x70] sm:$0xff]  ;;  %1054 = vmatprep.subr.bf16.mxu1 %v1312_v1  ;;  %v57_v3 = vld [vmem:[%s1830_s1 + $0x68] sm:$0xff] }
   0x2   :  { %101 = vmatpush1.msra.mxu0 %v59_v0  ;;  %v56_v4 = vld [vmem:[%s1830_s1 + $0x60] sm:$0xff]  ;;  %v29_v5 = vld [vmem:[%s1829_s0 + $0x8] sm:$0xff]  ;;  %v55_v6 = vld [vmem:[%s1830_s1 + $0x58] sm:$0xff] }
   0x3   :  { %102 = vmatprep.subr.mxu0 %v1312_v1  ;;  %v54_v7 = vld [vmem:[%s1830_s1 + $0x50] sm:$0xff]  ;;  %926 = vmatprep.mubr.msk.f32.mxu0 %vm71_vm0, %v29_v5  ;;  %v53_v8 = vld [vmem:[%s1830_s1 + $0x48] sm:$0xff]  ;;  %v52_v9 = vld [vmem:[%s1830_s1 + $0x40] sm:$0xff] }
   0x4   :  { %103 = vmatpush1.msra.mxu0 %v58_v2 }
   0x5   :  { %104 = vmatprep.subr.mxu0 %v1312_v1 }
   0x6   :  { %105 = vmatpush1.msra.mxu0 %v57_v3 }
   0x7   :  { %106 = vmatprep.subr.mxu0 %v1312_v1 }
   0x8   :  { %107 = vmatpush1.msra.mxu0 %v56_v4 }
   0x9   :  { %108 = vmatprep.subr.mxu0 %v1312_v1 }
   0xa   :  { %109 = vmatpush1.msra.mxu0 %v55_v6 }
   0xb   :  { %110 = vmatprep.subr.mxu0 %v1312_v1 }
   0xc   :  { %111 = vmatpush1.msra.mxu0 %v54_v7 }
   0xd   :  { %112 = vmatprep.subr.mxu0 %v1312_v1 }
   0xe   :  { %12 = vsyncpa [#allocation3], 0  ;;  %113 = vmatpush1.msra.mxu0 %v53_v8  ;;  %v51_v10 = vld [vmem:[%s1830_s1 + $0x38] sm:$0xff]  ;;  %v50_v11 = vld [vmem:[%s1830_s1 + $0x30] sm:$0xff]  ;;  %vm96_vm1 = vcmask 1043456   ;;  %s1313_s25 = smov 64  }
   0xf   :  { %114 = vmatprep.subr.mxu0 %v1312_v1  ;;  %v49_v12 = vld [vmem:[%s1830_s1 + $0x28] sm:$0xff]  ;;  %v48_v13 = vld [vmem:[%s1830_s1 + $0x20] sm:$0xff]  ;;  %v47_v14 = vld [vmem:[%s1830_s1 + $0x18] sm:$0xff]  ;;  %s1314_s11 = smov 96   ;;  %vm1315_vm2 = vmmov 0   ;;  %vm235_vm3 = vcmask 261120  }
  0x10   :  { %115 = vmatpush1.msra.mxu0 %v52_v9  ;;  %v46_v15 = vld [vmem:[%s1830_s1 + $0x10] sm:$0xff]  ;;  %v45_v16 = vld [vmem:[%s1830_s1 + $0x8] sm:$0xff]  ;;  %v44_v17 = vld [vmem:[%s1830_s1] sm:$0xff]  ;;  %1070 = vmatprep.mubr.msk.bf16.mxu1 %vm1315_vm2, %v1312_v1  ;;  %vm908_vm5 = vcmask 74752  }
  0x11   :  { %116 = vmatprep.subr.mxu0 %v1312_v1  ;;  %v63_v18 = vld [vmem:[%s1830_s1 + $0x98] sm:$0xf]  ;;  %v62_v19 = vld [vmem:[%s1830_s1 + $0x90] sm:$0xff]  ;;  %v61_v20 = vld [vmem:[%s1830_s1 + $0x88] sm:$0xff] }
  0x12   :  { %117 = vmatpush1.msra.mxu0 %v51_v10  ;;  %v60_v21 = vld [vmem:[%s1830_s1 + $0x80] sm:$0xff]  ;;  %v1459_v35 = vld [vmem:[%s1831_s2 + $0x38] sm:$0xff]   ;;  %v1465_v36 = vld [vmem:[%s1831_s2 + $0x30] sm:$0xff]  }
  0x13   :  { %118 = vmatprep.subr.mxu0 %v1312_v1  ;;  %v28_v22 = vld [vmem:[%s1829_s0] sm:$0xff]  ;;  %1055 = vmatpush3.bf16.msra.mxu1 %v1459_v35  ;;  %v31_v37 = vld [vmem:[%s1829_s0 + $0x18] sm:$0xff]  ;;  %v1478_v38 = vld [vmem:[%s1831_s2 + $0x28] sm:$0xff]  }
  0x14   :  { %119 = vmatpush1.msra.mxu0 %v50_v11  ;;  %v1449_v23 = vld [vmem:[%s1832_s3] ss:$0 sm:$0xff]  ;;  %1056 = vmatprep.subr.bf16.mxu1 %v1312_v1  ;;  %v1497_v41 = vld [vmem:[%s1831_s2 + $0x18] sm:$0xff]   ;;  %v1506_v42 = vld [vmem:[%s1831_s2 + $0x10] sm:$0xff]  }
  0x15   :  { %120 = vmatprep.subr.mxu0 %v1312_v1  ;;  %v934_v30 = vld [vmem:[%s1833_s4] ss:$0 sm:$0xff]  ;;  %v1515_v43 = vld [vmem:[%s1831_s2 + $0x8] sm:$0xff]   ;;  %v30_v45 = vld [vmem:[%s1829_s0 + $0x10] sm:$0xff] }
  0x16   :  { %121 = vmatpush1.msra.mxu0 %v49_v12  ;;  %v1487_v40 = vld [vmem:[%s1831_s2 + $0x20] sm:$0xff]   ;;  %vm1542_vm4 = vmpackc.low %vm235_vm3, %vm235_vm3  ;;  %v33_v7 = vld [vmem:[%s1829_s0 + $0x28] sm:$0xff] }
  0x17   :  { %122 = vmatprep.subr.mxu0 %v1312_v1  ;;  %1057 = vmatpush3.bf16.msra.mxu1 %v1465_v36  ;;  %v1524_v44 = vld [vmem:[%s1831_s2] sm:$0xff]  }
  0x18   :  { %123 = vmatpush1.msra.mxu0 %v48_v13  ;;  %1058 = vmatprep.subr.bf16.mxu1 %v1312_v1  ;;  %v32_v9 = vld [vmem:[%s1829_s0 + $0x20] sm:$0xff] }
  0x19   :  { %124 = vmatprep.subr.mxu0 %v1312_v1 }
  0x1a   :  { %125 = vmatpush1.msra.mxu0 %v47_v14 }
  0x1b   :  { %126 = vmatprep.subr.mxu0 %v1312_v1  ;;  %1059 = vmatpush3.bf16.msra.mxu1 %v1478_v38 }
  0x1c   :  { %127 = vmatpush1.msra.mxu0 %v46_v15  ;;  %1060 = vmatprep.subr.bf16.mxu1 %v1312_v1 }
  0x1d   :  { %128 = vmatprep.subr.mxu0 %v1312_v1 }
  0x1e   :  { %129 = vmatpush1.msra.mxu0 %v45_v16 }
  0x1f   :  { %130 = vmatprep.subr.mxu0 %v1312_v1  ;;  %1061 = vmatpush3.bf16.msra.mxu1 %v1487_v40 }
  0x20   :  { %131 = vmatpush1.msra.mxu0 %v44_v17  ;;  %1062 = vmatprep.subr.bf16.mxu1 %v1312_v1 }
  0x21   :  { %156 = vmatprep.subr.mxu0 %v1312_v1 }
  0x22   :  { %925 = vmatpush2.msk.msra.mxu0 %vm96_vm1, %v63_v18 }
  0x23   :  { %158 = vmatprep.subr.mxu0 %v1312_v1  ;;  %1063 = vmatpush3.bf16.msra.mxu1 %v1497_v41 }
  0x24   :  { %159 = vmatpush2.msra.mxu0 %v62_v19  ;;  %1064 = vmatprep.subr.bf16.mxu1 %v1312_v1 }
  0x25   :  { %160 = vmatprep.subr.mxu0 %v1312_v1 }
  0x26   :  { %161 = vmatpush2.msra.mxu0 %v61_v20 }
  0x27   :  { %162 = vmatprep.subr.mxu0 %v1312_v1  ;;  %1065 = vmatpush3.bf16.msra.mxu1 %v1506_v42 }
  0x28   :  { %163 = vmatpush2.msra.mxu0 %v60_v21  ;;  %1066 = vmatprep.subr.bf16.mxu1 %v1312_v1 }
  0x29   :  { %165 = vmatmul.mubr.f32.vlgmr.msra.gmra.mxu0 %v28_v22  ;;  %1094 = vmatprep.subr.bf16.mxu0 %v1312_v1 }
  0x2a   :  { %1095 = vmatpush3.bf16.msra.mxu0 %v1459_v35  ;;  %927 = vmatprep.mubr.msk.f32.mxu0 %vm71_vm0, %v31_v37  ;;  %v35_v37 = vld [vmem:[%s1829_s0 + $0x38] sm:$0xff] }
  0x2b   :  { %1096 = vmatprep.subr.bf16.mxu0 %v1312_v1  ;;  %1067 = vmatpush3.bf16.msra.mxu1 %v1515_v43 }
  0x2c   :  { %1068 = vmatprep.subr.bf16.mxu1 %v1312_v1 }
  0x2d   :  { %170 = vmatmul.mubr.f32.gmra.mxu0 %v30_v45  ;;  %v37_v45 = vld [vmem:[%s1829_s0 + $0x48] sm:$0xff] }
  0x2e   :  { %1097 = vmatpush3.bf16.msra.mxu0 %v1465_v36  ;;  %928 = vmatprep.mubr.msk.f32.mxu0 %vm71_vm0, %v33_v7 }
  0x2f   :  { %1098 = vmatprep.subr.bf16.mxu0 %v1312_v1  ;;  %1069 = vmatpush3.bf16.msra.mxu1 %v1524_v44 }
  0x30   :  { %1074 = vmatprep.subr.bf16.mxu1 %v1312_v1 }
  0x31   :  { %175 = vmatmul.mubr.f32.gmra.mxu0 %v32_v9 }
  0x32   :  { %1099 = vmatpush3.bf16.msra.mxu0 %v1478_v38  ;;  %929 = vmatprep.mubr.msk.f32.mxu0 %vm71_vm0, %v35_v37 }
  0x33   :  { %1100 = vmatprep.subr.bf16.mxu0 %v1312_v1 }
  0x36   :  { %1101 = vmatpush3.bf16.msra.mxu0 %v1487_v40 }
  0x37   :  { %1102 = vmatprep.subr.bf16.mxu0 %v1312_v1 }
  0x3a   :  { %1103 = vmatpush3.bf16.msra.mxu0 %v1497_v41 }
  0x3b   :  { %1104 = vmatprep.subr.bf16.mxu0 %v1312_v1 }
  0x3e   :  { %1105 = vmatpush3.bf16.msra.mxu0 %v1506_v42 }
  0x3f   :  { %1106 = vmatprep.subr.bf16.mxu0 %v1312_v1 }
  0x42   :  { %1107 = vmatpush3.bf16.msra.mxu0 %v1515_v43 }
  0x43   :  { %1108 = vmatprep.subr.bf16.mxu0 %v1312_v1 }
  0x46   :  { %1109 = vmatpush3.bf16.msra.mxu0 %v1524_v44 }
  0x47   :  { %1134 = vmatprep.subr.bf16.mxu0 %v1312_v1 }
  0xe9   :  { %v166_v24 = vpop.f32.mrf.mxu0 }
  0xea   :  { %v167_v25 = vadd.f32 %v1449_v23, %v166_v24 }
  0xeb   :  { %v168_v26 = vpop.f32.mrf.mxu0 }
  0xec   :  { %v935_v27 = vmul.f32 -1.442695, %v167_v25 }
  0xed   :  { %v171_v52 = vpop.f32.mrf.mxu0 }
  0xee   :  { %1242 = vpow2.f32 %v935_v27  ;;  %v172_v60 = vadd.f32 %v1449_v23, %v171_v52  ;;  %v40_v52 = vld [vmem:[%s1829_s0 + $0x60] sm:$0xff] }
  0xef   :  { %v173_v53 = vpop.f32.mrf.mxu0 }
  0xf0   :  { %v43_v53 = vld [vmem:[%s1829_s0 + $0x78] sm:$0xff] }
  0xf1   :  { %v176_v17 = vpop.f32.mrf.mxu0 }
  0xf3   :  { %v178_v18 = vpop.f32.mrf.mxu0 }
  0xfb   :  { %v1243_v28 = vpop.eup %1242 }
  0xfc   :  { %v215_v29 = vadd.f32 1.0, %v1243_v28 }
  0xfe   :  { %1244 = vrcp.f32 %v215_v29 }
 0x10b   :  { %v1245_v31 = vpop.eup %1244 }
 0x10c   :  { %v218_v32 = vmul.f32 %v1245_v31, %v934_v30  ;;  %v225_v46 = vsub.f32 1.0, %v1245_v31 }
 0x10e   :  { %220 = vrot.lane.b32.xlu0 %v218_v32, %s1313_s25 }
 0x180   :  { %v221_v33 = vpop.permute.xlu0 %220 }
 0x181   :  { %v223_v34 = vadd.f32 %v221_v33, %v167_v25  ;;  %v177_v25 = vadd.f32 %v1449_v23, %v176_v17 }
 0x183   :  { %1246 = vtanh.f32 %v223_v34 }
 0x190   :  { %v1247_v39 = vpop.eup %1246 }
 0x191   :  { %227 = vrot.lane.b32.xlu0 %v1247_v39, %s1314_s11  ;;  %v34_v39 = vld [vmem:[%s1829_s0 + $0x30] sm:$0xff] }
 0x192   :  { %180 = vmatmul.mubr.f32.gmra.mxu0 %v34_v39 }
 0x193   :  { %930 = vmatprep.mubr.msk.f32.mxu0 %vm71_vm0, %v37_v45 }
 0x203   :  { %v228_v47 = vpop.permute.xlu0 %227 }
 0x204   :  { %v230_v48 = vmul.f32 %v228_v47, %v225_v46  ;;  %v36_v46 = vld [vmem:[%s1829_s0 + $0x40] sm:$0xff]  ;;  %v39_v47 = vld [vmem:[%s1829_s0 + $0x58] sm:$0xff] }
 0x205   :  { %185 = vmatmul.mubr.f32.gmra.mxu0 %v36_v46 }
 0x206   :  { %232 = vrot.lane.b32.xlu1 %v230_v48, %s1314_s11  ;;  %931 = vmatprep.mubr.msk.f32.mxu0 %vm71_vm0, %v39_v47 }
 0x20a   :  { %343 = vrot.lane.b32.xlu1 %v934_v30, %s1313_s25 }
 0x278   :  { %v233_v49 = vpop.permute.xlu1 %232 }
 0x279   :  { %v945_v51 = vpack.c.bf16 %v233_v49, %v233_v49 }
 0x27b   :  { %1071 = vmatmul.mubr.msk.bf16.vlgmr.msra.gmra.mxu1 %vm1542_vm4, %v945_v51  ;;  %v41_v51 = vld [vmem:[%s1829_s0 + $0x68] sm:$0xff] }
 0x27c   :  { %1075 = vmatpush3.bf16.msra.mxu1 %v1459_v35  ;;  %1090 = vmatprep.mubr.msk.bf16.mxu1 %vm1315_vm2, %v1312_v1  ;;  %v1566_v54 = vpop.permute.xlu1 %343 }
 0x27d   :  { %1076 = vmatprep.subr.bf16.mxu1 %v1312_v1 }
 0x280   :  { %1077 = vmatpush3.bf16.msra.mxu1 %v1465_v36 }
 0x281   :  { %1078 = vmatprep.subr.bf16.mxu1 %v1312_v1 }
 0x284   :  { %1079 = vmatpush3.bf16.msra.mxu1 %v1478_v38 }
 0x285   :  { %1080 = vmatprep.subr.bf16.mxu1 %v1312_v1 }
 0x288   :  { %1081 = vmatpush3.bf16.msra.mxu1 %v1487_v40 }
 0x289   :  { %1082 = vmatprep.subr.bf16.mxu1 %v1312_v1 }
 0x28c   :  { %1083 = vmatpush3.bf16.msra.mxu1 %v1497_v41 }
 0x28d   :  { %1084 = vmatprep.subr.bf16.mxu1 %v1312_v1 }
 0x290   :  { %1085 = vmatpush3.bf16.msra.mxu1 %v1506_v42 }
 0x291   :  { %1086 = vmatprep.subr.bf16.mxu1 %v1312_v1 }
 0x294   :  { %1087 = vmatpush3.bf16.msra.mxu1 %v1515_v43 }
 0x295   :  { %1088 = vmatprep.subr.bf16.mxu1 %v1312_v1 }
 0x298   :  { %1089 = vmatpush3.bf16.msra.mxu1 %v1524_v44 }
 0x299   :  { %1114 = vmatprep.subr.bf16.mxu1 %v1312_v1 }
 0x33b   :  { %v336_v55 = vpop.f32.mrf.mxu1 }
 0x33c   :  { %v346_v56 = vadd.f32 %v1566_v54, %v336_v55  ;;  %v342_v61 = vadd.f32 %v336_v55, %v172_v60  ;;  %v42_v55 = vld [vmem:[%s1829_s0 + $0x70] sm:$0xff] }
 0x33d   :  { %v1072_v57 = vpop.f32.mrf.mxu1 }
 0x33e   :  { %354 = vrot.lane.b32.xlu0 %v346_v56, %s1313_s25  ;;  %v947_v62 = vmul.f32 -1.442695, %v342_v61  ;;  %v181_v61 = vpop.f32.mrf.mxu0 }
 0x33f   :  { %v339_v58 = vpop.f32.mrf.mxu1 }
 0x340   :  { %1248 = vpow2.f32 %v947_v62  ;;  %v183_v62 = vpop.f32.mrf.mxu0 }
 0x341   :  { %v1073_v59 = vpop.f32.mrf.mxu1 }
 0x34d   :  { %v1249_v63 = vpop.eup %1248 }
 0x34e   :  { %v350_v0 = vadd.f32 1.0, %v1249_v63  ;;  %v1648_v63 = vpop.f32.mrf.mxu0 }
 0x34f   :  { %v187_v47 = vadd.f32 %v1449_v23, %v1648_v63 }
 0x350   :  { %1250 = vrcp.f32 %v350_v0  ;;  %v188_v0 = vpop.f32.mrf.mxu0 }
 0x35d   :  { %v1251_v2 = vpop.eup %1250 }
 0x35e   :  { %v364_v10 = vsub.f32 1.0, %v1251_v2  ;;  %v370_v12 = vmul.f32 %v1251_v2, %v230_v48  ;;  %v38_v48 = vld [vmem:[%s1829_s0 + $0x50] sm:$0xff] }
 0x35f   :  { %190 = vmatmul.mubr.f32.gmra.mxu0 %v38_v48 }
 0x360   :  { %932 = vmatprep.mubr.msk.f32.mxu0 %vm71_vm0, %v41_v51 }
 0x363   :  { %195 = vmatmul.mubr.f32.gmra.mxu0 %v40_v52 }
 0x364   :  { %933 = vmatprep.mubr.msk.f32.mxu0 %vm71_vm0, %v43_v53 }
 0x367   :  { %200 = vmatmul.mubr.f32.gmra.mxu0 %v42_v55 }
 0x368   :  { %1110 = vmatprep.mubr.msk.bf16.mxu0 %vm1315_vm2, %v1312_v1 }
 0x3b0   :  { %v355_v3 = vpop.permute.xlu0 %354 }
 0x3b1   :  { %v357_v4 = vmul.f32 %v1251_v2, %v355_v3 }
 0x3b3   :  { %359 = vrot.lane.b32.xlu1 %v357_v4, %s1313_s25 }
 0x41f   :  { %v1650_v2 = vpop.f32.mrf.mxu0 }
 0x421   :  { %v193_v3 = vpop.f32.mrf.mxu0 }
 0x423   :  { %v1652_v4 = vpop.f32.mrf.mxu0 }
 0x425   :  { %v360_v5 = vpop.permute.xlu1 %359 }
 0x426   :  { %v362_v6 = vadd.f32 %v360_v5, %v172_v60  ;;  %v198_v5 = vpop.f32.mrf.mxu0 }
 0x428   :  { %1252 = vtanh.f32 %v362_v6  ;;  %v1654_v6 = vpop.f32.mrf.mxu0 }
 0x42a   :  { %v203_v7 = vpop.f32.mrf.mxu0 }
 0x42b   :  { %v192_v7 = vadd.f32 %v1449_v23, %v1650_v2 }
 0x435   :  { %v1253_v8 = vpop.eup %1252 }
 0x436   :  { %366 = vrot.lane.b32.xlu0 %v1253_v8, %s1314_s11 }
 0x4a8   :  { %v367_v11 = vpop.permute.xlu0 %366 }
 0x4a9   :  { %v369_v13 = vmul.f32 %v367_v11, %v364_v10 }
 0x4ab   :  { %v1580_v14 = vadd.f32 %v370_v12, %v369_v13 }
 0x4ad   :  { %373 = vrot.lane.b32.xlu1 %v1580_v14, %s1314_s11 }
 0x51f   :  { %v374_v15 = vpop.permute.xlu1 %373 }
 0x520   :  { %v949_v16 = vpack.c.bf16 %v374_v15, %v374_v15  ;;  %v182_v15 = vadd.f32 %v1449_v23, %v181_v61 }
 0x522   :  { %1091 = vmatmul.mubr.msk.bf16.vlgmr.msra.gmra.mxu1 %vm1542_vm4, %v949_v16 }
 0x523   :  { %1115 = vmatpush3.bf16.msra.mxu1 %v1459_v35  ;;  %1130 = vmatprep.mubr.msk.bf16.mxu1 %vm1315_vm2, %v1312_v1 }
 0x524   :  { %1116 = vmatprep.subr.bf16.mxu1 %v1312_v1 }
 0x527   :  { %1117 = vmatpush3.bf16.msra.mxu1 %v1465_v36 }
 0x528   :  { %1118 = vmatprep.subr.bf16.mxu1 %v1312_v1 }
 0x52b   :  { %1119 = vmatpush3.bf16.msra.mxu1 %v1478_v38 }
 0x52c   :  { %1120 = vmatprep.subr.bf16.mxu1 %v1312_v1 }
 0x52f   :  { %1121 = vmatpush3.bf16.msra.mxu1 %v1487_v40 }
 0x530   :  { %1122 = vmatprep.subr.bf16.mxu1 %v1312_v1 }
 0x533   :  { %1123 = vmatpush3.bf16.msra.mxu1 %v1497_v41 }
 0x534   :  { %1124 = vmatprep.subr.bf16.mxu1 %v1312_v1 }
 0x537   :  { %1125 = vmatpush3.bf16.msra.mxu1 %v1506_v42 }
 0x538   :  { %1126 = vmatprep.subr.bf16.mxu1 %v1312_v1 }
 0x53b   :  { %1127 = vmatpush3.bf16.msra.mxu1 %v1515_v43 }
 0x53c   :  { %1128 = vmatprep.subr.bf16.mxu1 %v1312_v1 }
 0x53f   :  { %1129 = vmatpush3.bf16.msra.mxu1 %v1524_v44 }
 0x540   :  { %1154 = vmatprep.subr.bf16.mxu1 %v1312_v1 }
 0x5e2   :  { %v412_v19 = vpop.f32.mrf.mxu1 }
 0x5e3   :  { %v419_v20 = vadd.f32 %v412_v19, %v1566_v54  ;;  %v418_v26 = vadd.f32 %v412_v19, %v177_v25 }
 0x5e4   :  { %v1092_v21 = vpop.f32.mrf.mxu1 }
 0x5e5   :  { %427 = vrot.lane.b32.xlu0 %v419_v20, %s1313_s25  ;;  %v951_v27 = vmul.f32 -1.442695, %v418_v26 }
 0x5e6   :  { %v415_v22 = vpop.f32.mrf.mxu1 }
 0x5e7   :  { %1254 = vpow2.f32 %v951_v27 }
 0x5e8   :  { %v1093_v24 = vpop.f32.mrf.mxu1 }
 0x5f4   :  { %v1255_v28 = vpop.eup %1254 }
 0x5f5   :  { %v423_v29 = vadd.f32 1.0, %v1255_v28 }
 0x5f7   :  { %1256 = vrcp.f32 %v423_v29 }
 0x604   :  { %v1257_v30 = vpop.eup %1256 }
 0x605   :  { %v437_v56 = vsub.f32 1.0, %v1257_v30  ;;  %v443_v58 = vmul.f32 %v1257_v30, %v1580_v14 }
 0x657   :  { %v428_v31 = vpop.permute.xlu0 %427 }
 0x658   :  { %v430_v32 = vmul.f32 %v1257_v30, %v428_v31 }
 0x65a   :  { %432 = vrot.lane.b32.xlu1 %v430_v32, %s1313_s25 }
 0x6cc   :  { %v433_v33 = vpop.permute.xlu1 %432 }
 0x6cd   :  { %v435_v34 = vadd.f32 %v433_v33, %v177_v25 }
 0x6cf   :  { %1258 = vtanh.f32 %v435_v34 }
 0x6dc   :  { %v1259_v49 = vpop.eup %1258 }
 0x6dd   :  { %439 = vrot.lane.b32.xlu0 %v1259_v49, %s1314_s11 }
 0x74f   :  { %v440_v57 = vpop.permute.xlu0 %439 }
 0x750   :  { %v442_v59 = vmul.f32 %v440_v57, %v437_v56 }
 0x752   :  { %v444_v60 = vadd.f32 %v443_v58, %v442_v59 }
 0x754   :  { %446 = vrot.lane.b32.xlu1 %v444_v60, %s1314_s11 }
 0x7c6   :  { %v447_v8 = vpop.permute.xlu1 %446 }
 0x7c7   :  { %v953_v9 = vpack.c.bf16 %v447_v8, %v447_v8 }
 0x7c9   :  { %1111 = vmatmul.mubr.msk.bf16.vlgmr.msra.gmra.mxu0 %vm1542_vm4, %v953_v9 }
 0x7ca   :  { %1135 = vmatpush3.bf16.msra.mxu0 %v1459_v35  ;;  %1150 = vmatprep.mubr.msk.bf16.mxu0 %vm1315_vm2, %v1312_v1 }
 0x7cb   :  { %1136 = vmatprep.subr.bf16.mxu0 %v1312_v1 }
 0x7ce   :  { %1137 = vmatpush3.bf16.msra.mxu0 %v1465_v36 }
 0x7cf   :  { %1138 = vmatprep.subr.bf16.mxu0 %v1312_v1 }
 0x7d2   :  { %1139 = vmatpush3.bf16.msra.mxu0 %v1478_v38 }
 0x7d3   :  { %1140 = vmatprep.subr.bf16.mxu0 %v1312_v1 }
 0x7d6   :  { %1141 = vmatpush3.bf16.msra.mxu0 %v1487_v40 }
 0x7d7   :  { %1142 = vmatprep.subr.bf16.mxu0 %v1312_v1 }
 0x7da   :  { %1143 = vmatpush3.bf16.msra.mxu0 %v1497_v41 }
 0x7db   :  { %1144 = vmatprep.subr.bf16.mxu0 %v1312_v1 }
 0x7de   :  { %1145 = vmatpush3.bf16.msra.mxu0 %v1506_v42 }
 0x7df   :  { %1146 = vmatprep.subr.bf16.mxu0 %v1312_v1 }
 0x7e2   :  { %1147 = vmatpush3.bf16.msra.mxu0 %v1515_v43 }
 0x7e3   :  { %1148 = vmatprep.subr.bf16.mxu0 %v1312_v1 }
 0x7e6   :  { %1149 = vmatpush3.bf16.msra.mxu0 %v1524_v44 }
 0x7e7   :  { %1174 = vmatprep.subr.bf16.mxu0 %v1312_v1 }
 0x889   :  { %v485_v10 = vpop.f32.mrf.mxu0 }
 0x88a   :  { %v492_v11 = vadd.f32 %v485_v10, %v1566_v54  ;;  %v491_v16 = vadd.f32 %v485_v10, %v182_v15 }
 0x88b   :  { %v1112_v12 = vpop.f32.mrf.mxu0 }
 0x88c   :  { %500 = vrot.lane.b32.xlu0 %v492_v11, %s1313_s25  ;;  %v955_v17 = vmul.f32 -1.442695, %v491_v16 }
 0x88d   :  { %v488_v13 = vpop.f32.mrf.mxu0 }
 0x88e   :  { %1260 = vpow2.f32 %v955_v17 }
 0x88f   :  { %v1113_v14 = vpop.f32.mrf.mxu0 }
 0x89b   :  { %v1261_v18 = vpop.eup %1260 }
 0x89c   :  { %v496_v19 = vadd.f32 1.0, %v1261_v18 }
 0x89e   :  { %1262 = vrcp.f32 %v496_v19 }
 0x8ab   :  { %v1263_v20 = vpop.eup %1262 }
 0x8ac   :  { %v510_v27 = vsub.f32 1.0, %v1263_v20  ;;  %v516_v29 = vmul.f32 %v1263_v20, %v444_v60 }
 0x8fe   :  { %v501_v21 = vpop.permute.xlu0 %500 }
 0x8ff   :  { %v503_v22 = vmul.f32 %v1263_v20, %v501_v21 }
 0x901   :  { %505 = vrot.lane.b32.xlu1 %v503_v22, %s1313_s25 }
 0x973   :  { %v506_v24 = vpop.permute.xlu1 %505 }
 0x974   :  { %v508_v25 = vadd.f32 %v506_v24, %v182_v15 }
 0x976   :  { %1264 = vtanh.f32 %v508_v25 }
 0x983   :  { %v1265_v26 = vpop.eup %1264 }
 0x984   :  { %512 = vrot.lane.b32.xlu0 %v1265_v26, %s1314_s11 }
 0x9f6   :  { %v513_v28 = vpop.permute.xlu0 %512 }
 0x9f7   :  { %v515_v30 = vmul.f32 %v513_v28, %v510_v27  ;;  %v197_v27 = vadd.f32 %v1449_v23, %v1652_v4 }
 0x9f9   :  { %v517_v31 = vadd.f32 %v516_v29, %v515_v30 }
 0x9fb   :  { %519 = vrot.lane.b32.xlu1 %v517_v31, %s1314_s11 }
 0xa6d   :  { %v520_v32 = vpop.permute.xlu1 %519 }
 0xa6e   :  { %v957_v33 = vpack.c.bf16 %v520_v32, %v520_v32 }
 0xa70   :  { %1131 = vmatmul.mubr.msk.bf16.vlgmr.msra.gmra.mxu1 %vm1542_vm4, %v957_v33 }
 0xa71   :  { %1155 = vmatpush3.bf16.msra.mxu1 %v1459_v35  ;;  %1170 = vmatprep.mubr.msk.bf16.mxu1 %vm1315_vm2, %v1312_v1 }
 0xa72   :  { %1156 = vmatprep.subr.bf16.mxu1 %v1312_v1 }
 0xa75   :  { %1157 = vmatpush3.bf16.msra.mxu1 %v1465_v36 }
 0xa76   :  { %1158 = vmatprep.subr.bf16.mxu1 %v1312_v1 }
 0xa79   :  { %1159 = vmatpush3.bf16.msra.mxu1 %v1478_v38 }
 0xa7a   :  { %1160 = vmatprep.subr.bf16.mxu1 %v1312_v1 }
 0xa7d   :  { %1161 = vmatpush3.bf16.msra.mxu1 %v1487_v40 }
 0xa7e   :  { %1162 = vmatprep.subr.bf16.mxu1 %v1312_v1 }
 0xa81   :  { %1163 = vmatpush3.bf16.msra.mxu1 %v1497_v41 }
 0xa82   :  { %1164 = vmatprep.subr.bf16.mxu1 %v1312_v1 }
 0xa85   :  { %1165 = vmatpush3.bf16.msra.mxu1 %v1506_v42 }
 0xa86   :  { %1166 = vmatprep.subr.bf16.mxu1 %v1312_v1 }
 0xa89   :  { %1167 = vmatpush3.bf16.msra.mxu1 %v1515_v43 }
 0xa8a   :  { %1168 = vmatprep.subr.bf16.mxu1 %v1312_v1 }
 0xa8d   :  { %1169 = vmatpush3.bf16.msra.mxu1 %v1524_v44 }
 0xa8e   :  { %1194 = vmatprep.subr.mxu1 %v1312_v1 }
 0xb30   :  { %v558_v34 = vpop.f32.mrf.mxu1 }
 0xb31   :  { %v565_v37 = vadd.f32 %v558_v34, %v1566_v54  ;;  %v564_v48 = vadd.f32 %v558_v34, %v187_v47 }
 0xb32   :  { %v1132_v39 = vpop.f32.mrf.mxu1 }
 0xb33   :  { %573 = vrot.lane.b32.xlu0 %v565_v37, %s1313_s25  ;;  %v959_v49 = vmul.f32 -1.442695, %v564_v48 }
 0xb34   :  { %v561_v45 = vpop.f32.mrf.mxu1 }
 0xb35   :  { %1266 = vpow2.f32 %v959_v49 }
 0xb36   :  { %v1133_v46 = vpop.f32.mrf.mxu1 }
 0xb42   :  { %v1267_v51 = vpop.eup %1266 }
 0xb43   :  { %v569_v52 = vadd.f32 1.0, %v1267_v51 }
 0xb45   :  { %1268 = vrcp.f32 %v569_v52 }
 0xb52   :  { %v1269_v53 = vpop.eup %1268 }
 0xb53   :  { %v583_v60 = vsub.f32 1.0, %v1269_v53  ;;  %v589_v62 = vmul.f32 %v1269_v53, %v517_v31 }
 0xba5   :  { %v574_v55 = vpop.permute.xlu0 %573 }
 0xba6   :  { %v576_v56 = vmul.f32 %v1269_v53, %v574_v55 }
 0xba8   :  { %578 = vrot.lane.b32.xlu1 %v576_v56, %s1313_s25 }
 0xc1a   :  { %v579_v57 = vpop.permute.xlu1 %578 }
 0xc1b   :  { %v581_v58 = vadd.f32 %v579_v57, %v187_v47 }
 0xc1d   :  { %1270 = vtanh.f32 %v581_v58 }
 0xc2a   :  { %v1271_v59 = vpop.eup %1270 }
 0xc2b   :  { %585 = vrot.lane.b32.xlu0 %v1271_v59, %s1314_s11  ;;  %v202_v59 = vadd.f32 %v1449_v23, %v1654_v6  ;;  %v829_v23 = vld [vmem:[%s1834_s5 + $0x70] sm:$0xff]  ;;  %v828_v6 = vld [vmem:[%s1834_s5 + $0x68] sm:$0xff] }
 0xc9d   :  { %v586_v61 = vpop.permute.xlu0 %585 }
 0xc9e   :  { %v588_v63 = vmul.f32 %v586_v61, %v583_v60 }
 0xca0   :  { %v590_v0 = vadd.f32 %v589_v62, %v588_v63 }
 0xca2   :  { %592 = vrot.lane.b32.xlu1 %v590_v0, %s1314_s11 }
 0xd14   :  { %v593_v3 = vpop.permute.xlu1 %592 }
 0xd15   :  { %v961_v5 = vpack.c.bf16 %v593_v3, %v593_v3 }
 0xd17   :  { %1151 = vmatmul.mubr.msk.bf16.vlgmr.msra.gmra.mxu0 %vm1542_vm4, %v961_v5 }
 0xd18   :  { %1175 = vmatpush3.bf16.msra.mxu0 %v1459_v35  ;;  %1190 = vmatprep.mubr.msk.bf16.mxu0 %vm1315_vm2, %v1312_v1 }
 0xd19   :  { %1176 = vmatprep.subr.bf16.mxu0 %v1312_v1 }
 0xd1c   :  { %1177 = vmatpush3.bf16.msra.mxu0 %v1465_v36 }
 0xd1d   :  { %1178 = vmatprep.subr.bf16.mxu0 %v1312_v1 }
 0xd20   :  { %1179 = vmatpush3.bf16.msra.mxu0 %v1478_v38 }
 0xd21   :  { %1180 = vmatprep.subr.bf16.mxu0 %v1312_v1 }
 0xd24   :  { %1181 = vmatpush3.bf16.msra.mxu0 %v1487_v40 }
 0xd25   :  { %1182 = vmatprep.subr.bf16.mxu0 %v1312_v1 }
 0xd28   :  { %1183 = vmatpush3.bf16.msra.mxu0 %v1497_v41 }
 0xd29   :  { %1184 = vmatprep.subr.bf16.mxu0 %v1312_v1 }
 0xd2c   :  { %1185 = vmatpush3.bf16.msra.mxu0 %v1506_v42 }
 0xd2d   :  { %1186 = vmatprep.subr.bf16.mxu0 %v1312_v1 }
 0xd30   :  { %1187 = vmatpush3.bf16.msra.mxu0 %v1515_v43 }
 0xd31   :  { %1188 = vmatprep.subr.bf16.mxu0 %v1312_v1 }
 0xd34   :  { %1189 = vmatpush3.bf16.msra.mxu0 %v1524_v44 }
 0xdd7   :  { %v631_v35 = vpop.f32.mrf.mxu0 }
 0xdd8   :  { %v638_v36 = vadd.f32 %v631_v35, %v1566_v54  ;;  %v637_v42 = vadd.f32 %v631_v35, %v192_v7  ;;  %v830_v35 = vld [vmem:[%s1834_s5 + $0x78] sm:$0xff] }
 0xdd9   :  { %v1152_v38 = vpop.f32.mrf.mxu0 }
 0xdda   :  { %646 = vrot.lane.b32.xlu0 %v638_v36, %s1313_s25  ;;  %v963_v8 = vmul.f32 -1.442695, %v637_v42  ;;  %v827_v36 = vld [vmem:[%s1834_s5 + $0x60] sm:$0xff]  ;;  %v826_v38 = vld [vmem:[%s1834_s5 + $0x58] sm:$0xff] }
 0xddb   :  { %v634_v40 = vpop.f32.mrf.mxu0  ;;  %v823_v42 = vld [vmem:[%s1834_s5 + $0x40] sm:$0xff] }
 0xddc   :  { %1272 = vpow2.f32 %v963_v8  ;;  %v822_v8 = vld [vmem:[%s1834_s5 + $0x38] sm:$0xff] }
 0xddd   :  { %v1153_v41 = vpop.f32.mrf.mxu0 }
 0xdde   :  { %v825_v41 = vld [vmem:[%s1834_s5 + $0x50] sm:$0xff] }
 0xde9   :  { %v1273_v9 = vpop.eup %1272 }
 0xdea   :  { %v642_v43 = vadd.f32 1.0, %v1273_v9  ;;  %v821_v9 = vld [vmem:[%s1834_s5 + $0x30] sm:$0xff] }
 0xdec   :  { %1274 = vrcp.f32 %v642_v43  ;;  %v820_v43 = vld [vmem:[%s1834_s5 + $0x28] sm:$0xff] }
 0xdf9   :  { %v1275_v10 = vpop.eup %1274 }
 0xdfa   :  { %v656_v15 = vsub.f32 1.0, %v1275_v10  ;;  %v662_v2 = vmul.f32 %v1275_v10, %v590_v0 }
 0xe4c   :  { %v647_v11 = vpop.permute.xlu0 %646 }
 0xe4d   :  { %v649_v44 = vmul.f32 %v1275_v10, %v647_v11  ;;  %v819_v10 = vld [vmem:[%s1834_s5 + $0x20] sm:$0xff]  ;;  %v818_v11 = vld [vmem:[%s1834_s5 + $0x18] sm:$0xff] }
 0xe4f   :  { %651 = vrot.lane.b32.xlu1 %v649_v44, %s1313_s25  ;;  %v817_v44 = vld [vmem:[%s1834_s5 + $0x10] sm:$0xff] }
 0xec1   :  { %v652_v12 = vpop.permute.xlu1 %651 }
 0xec2   :  { %v654_v13 = vadd.f32 %v652_v12, %v192_v7  ;;  %v824_v7 = vld [vmem:[%s1834_s5 + $0x48] sm:$0xff] }
 0xec3   :  { %v816_v12 = vld [vmem:[%s1834_s5 + $0x8] sm:$0xff] }
 0xec4   :  { %1276 = vtanh.f32 %v654_v13  ;;  %v815_v13 = vld [vmem:[%s1834_s5] sm:$0xff]  ;;  %s1316_s5 = smov [#allocation2]  }
 0xec5   :  { %s916_s24 = sshll.u32 %s1316_s5, 4  ;;  %s917_s24 = int_to_ptr.vmem [resolvable:$true] %s916_s24 }
 0xec6   :  { %s1290_s3 = scalar_lea.vmem %s917_s24, 32  ;;  %p1295_p1 = scmp.lt.s32.totalorder %s917_s24, %s917_s24 }
 0xec7   :  { %p1291_p0 = scmp.ne.s32.totalorder %s917_s24, %s1290_s3  ;;  %p1296_p2 = scmp.lt.s32.totalorder %s1290_s3, %s1290_s3 }
 0xec9   :  { %p1297_p3 = por %p1296_p2, %p1295_p1 }
 0xecb   :  { %p1298_p4 = pnand %p1297_p3, %p1291_p0 }
 0xed1   :  { %v1277_v14 = vpop.eup %1276 }
 0xed2   :  { %658 = vrot.lane.b32.xlu0 %v1277_v14, %s1314_s11 }
 0xf44   :  { %v659_v16 = vpop.permute.xlu0 %658 }
 0xf45   :  { %v661_v17 = vmul.f32 %v659_v16, %v656_v15 }
 0xf47   :  { %v663_v18 = vadd.f32 %v662_v2, %v661_v17 }
 0xf49   :  { %665 = vrot.lane.b32.xlu1 %v663_v18, %s1314_s11 }
 0xfbb   :  { %v666_v19 = vpop.permute.xlu1 %665 }
 0xfbc   :  { %v965_v20 = vpack.c.bf16 %v666_v19, %v666_v19  ;;  %v972_v19 = vld [vmem:[%s1835_s6] ss:$0 sm:$0xff] }
 0xfbe   :  { %1171 = vmatmul.mubr.msk.bf16.vlgmr.msra.gmra.mxu1 %vm1542_vm4, %v965_v20 }
 0xfbf   :  { %1226 = vmatprep.mubr.msk.f32.mxu1 %vm1315_vm2, %v1312_v1  ;;  %1195 = vmatpush3.msra.mxu1 %v830_v35 }
 0xfc0   :  { %1196 = vmatprep.subr.mxu1 %v1312_v1 }
 0xfc1   :  { %1197 = vmatpush3.msra.mxu1 %v829_v23 }
 0xfc2   :  { %1198 = vmatprep.subr.mxu1 %v1312_v1 }
 0xfc3   :  { %1199 = vmatpush3.msra.mxu1 %v828_v6 }
 0xfc4   :  { %1200 = vmatprep.subr.mxu1 %v1312_v1 }
 0xfc5   :  { %1201 = vmatpush3.msra.mxu1 %v827_v36 }
 0xfc6   :  { %1202 = vmatprep.subr.mxu1 %v1312_v1 }
 0xfc7   :  { %1203 = vmatpush3.msra.mxu1 %v826_v38 }
 0xfc8   :  { %1204 = vmatprep.subr.mxu1 %v1312_v1 }
 0xfc9   :  { %1205 = vmatpush3.msra.mxu1 %v825_v41 }
 0xfca   :  { %1206 = vmatprep.subr.mxu1 %v1312_v1 }
 0xfcb   :  { %1207 = vmatpush3.msra.mxu1 %v824_v7 }
 0xfcc   :  { %1208 = vmatprep.subr.mxu1 %v1312_v1 }
 0xfcd   :  { %1209 = vmatpush3.msra.mxu1 %v823_v42 }
 0xfce   :  { %1210 = vmatprep.subr.mxu1 %v1312_v1 }
 0xfcf   :  { %1211 = vmatpush3.msra.mxu1 %v822_v8 }
 0xfd0   :  { %1212 = vmatprep.subr.mxu1 %v1312_v1 }
 0xfd1   :  { %1213 = vmatpush3.msra.mxu1 %v821_v9 }
 0xfd2   :  { %1214 = vmatprep.subr.mxu1 %v1312_v1 }
 0xfd3   :  { %1215 = vmatpush3.msra.mxu1 %v820_v43 }
 0xfd4   :  { %1216 = vmatprep.subr.mxu1 %v1312_v1 }
 0xfd5   :  { %1217 = vmatpush3.msra.mxu1 %v819_v10 }
 0xfd6   :  { %1218 = vmatprep.subr.mxu1 %v1312_v1 }
 0xfd7   :  { %1219 = vmatpush3.msra.mxu1 %v818_v11 }
 0xfd8   :  { %1220 = vmatprep.subr.mxu1 %v1312_v1 }
 0xfd9   :  { %1221 = vmatpush3.msra.mxu1 %v817_v44 }
 0xfda   :  { %1222 = vmatprep.subr.mxu1 %v1312_v1 }
 0xfdb   :  { %1223 = vmatpush3.msra.mxu1 %v816_v12 }
 0xfdc   :  { %1224 = vmatprep.subr.mxu1 %v1312_v1 }
 0xfdd   :  { %1225 = vmatpush3.msra.mxu1 %v815_v13 }
0x107e   :  { %v704_v21 = vpop.f32.mrf.mxu1 }
0x107f   :  { %v711_v22 = vadd.f32 %v704_v21, %v1566_v54  ;;  %v710_v28 = vadd.f32 %v704_v21, %v197_v27 }
0x1080   :  { %v1172_v24 = vpop.f32.mrf.mxu1 }
0x1081   :  { %719 = vrot.lane.b32.xlu0 %v711_v22, %s1313_s25  ;;  %v967_v29 = vmul.f32 -1.442695, %v710_v28 }
0x1082   :  { %v707_v25 = vpop.f32.mrf.mxu1 }
0x1083   :  { %1278 = vpow2.f32 %v967_v29 }
0x1084   :  { %v1173_v26 = vpop.f32.mrf.mxu1 }
0x1090   :  { %v1279_v30 = vpop.eup %1278 }
0x1091   :  { %v715_v31 = vadd.f32 1.0, %v1279_v30 }
0x1093   :  { %1280 = vrcp.f32 %v715_v31 }
0x10a0   :  { %v1281_v32 = vpop.eup %1280 }
0x10a1   :  { %v729_v46 = vsub.f32 1.0, %v1281_v32  ;;  %v735_v4 = vmul.f32 %v1281_v32, %v663_v18 }
0x10f3   :  { %v720_v33 = vpop.permute.xlu0 %719 }
0x10f4   :  { %v722_v34 = vmul.f32 %v1281_v32, %v720_v33 }
0x10f6   :  { %724 = vrot.lane.b32.xlu1 %v722_v34, %s1313_s25 }
0x1168   :  { %v725_v37 = vpop.permute.xlu1 %724 }
0x1169   :  { %v727_v39 = vadd.f32 %v725_v37, %v197_v27 }
0x116b   :  { %1282 = vtanh.f32 %v727_v39 }
0x1178   :  { %v1283_v45 = vpop.eup %1282 }
0x1179   :  { %731 = vrot.lane.b32.xlu0 %v1283_v45, %s1314_s11 }
0x11eb   :  { %v732_v47 = vpop.permute.xlu0 %731 }
0x11ec   :  { %v734_v48 = vmul.f32 %v732_v47, %v729_v46 }
0x11ee   :  { %v1745_v49 = vadd.f32 %v735_v4, %v734_v48 }
0x11f0   :  { %738 = vrot.lane.b32.xlu1 %v1745_v49, %s1314_s11 }
0x1262   :  { %v739_v51 = vpop.permute.xlu1 %738 }
0x1263   :  { %v969_v52 = vpack.c.bf16 %v739_v51, %v739_v51 }
0x1265   :  { %1191 = vmatmul.mubr.msk.bf16.vlgmr.msra.gmra.mxu0 %vm1542_vm4, %v969_v52 }
0x1325   :  { %v777_v53 = vpop.f32.mrf.mxu0 }
0x1326   :  { %v784_v55 = vadd.f32 %v777_v53, %v1566_v54  ;;  %v783_v60 = vadd.f32 %v777_v53, %v202_v59 }
0x1327   :  { %v1192_v56 = vpop.f32.mrf.mxu0 }
0x1328   :  { %792 = vrot.lane.b32.xlu0 %v784_v55, %s1313_s25  ;;  %v971_v61 = vmul.f32 -1.442695, %v783_v60 }
0x1329   :  { %v780_v57 = vpop.f32.mrf.mxu0 }
0x132a   :  { %1284 = vpow2.f32 %v971_v61 }
0x132b   :  { %v1193_v58 = vpop.f32.mrf.mxu0 }
0x1337   :  { %v1285_v62 = vpop.eup %1284 }
0x1338   :  { %v788_v63 = vadd.f32 1.0, %v1285_v62 }
0x133a   :  { %1286 = vrcp.f32 %v788_v63 }
0x1347   :  { %v1287_v0 = vpop.eup %1286 }
0x1348   :  { %v802_v14 = vsub.f32 1.0, %v1287_v0  ;;  %v808_v16 = vmul.f32 %v1287_v0, %v1745_v49 }
0x139a   :  { %v793_v50 = vpop.permute.xlu0 %792 }
0x139b   :  { %v795_v3 = vmul.f32 %v1287_v0, %v793_v50 }
0x139d   :  { %797 = vrot.lane.b32.xlu1 %v795_v3, %s1313_s25 }
0x140f   :  { %v798_v54 = vpop.permute.xlu1 %797 }
0x1410   :  { %v800_v5 = vadd.f32 %v798_v54, %v202_v59 }
0x1412   :  { %1288 = vtanh.f32 %v800_v5 }
0x141f   :  { %v1289_v40 = vpop.eup %1288 }
0x1420   :  { %804 = vrot.lane.b32.xlu0 %v1289_v40, %s1314_s11 }
0x1492   :  { %v805_v15 = vpop.permute.xlu0 %804 }
0x1493   :  { %v807_v2 = vmul.f32 %v805_v15, %v802_v14 }
0x1495   :  { %v809_v17 = vadd.f32 %v808_v16, %v807_v2 }
0x1497   :  { %811 = vrot.lane.b32.xlu1 %v809_v17, %s1314_s11 }
0x1509   :  { %v812_v18 = vpop.permute.xlu1 %811 }
0x150a   :  { %1227 = vmatmul.mubr.msk.f32.vlgmr.msra.gmra.mxu1 %vm235_vm3, %v812_v18 }
0x15ca   :  { %v904_v20 = vpop.f32.mrf.mxu1 }
0x15cb   :  { %v905_v1 = vadd.f32 %v972_v19, %v904_v20 }
0x15cc   :  { %v1228_v21 = vpop.f32.mrf.mxu1 }
0x15cd   :  { %909 = vst.msk [vmem:[#allocation2] sm:$0x3] %vm908_vm5, %v905_v1 }
0x15ce   :  { %1301 = shalt.err (!%p1298_p4)
}
0x15cf   :  { %919 = dma.vmem_to_hbm [thread:$0]  %s917_s24, 32, %s1836_s7, [#allocation3]  }
0x15d0   :  { %1310 = dma.done.wait [#allocation3], 32  }
0x15d1   :  { %1311 = vsyncadd [#allocation3], 4294967264 }
0x15d2   :  { %923 = vsyncpa [#allocation3], 1 }

</bundles_post_ra>
